<compile_context>
chip_gen: v7x
topology: tpu7x:2x2x1
jax: 0.10.0
libtpu: 0.0.40
codegen_flags: <defaults>
</compile_context>

<pallas_src>
import functools

import jax
import jax.numpy as jnp
from jax.experimental import pallas as pl
from jax.experimental.pallas import tpu as pltpu


# -----------------------------------------------------------------------------
# Kernel: one grid step == TB whole batch elements, flattened to M = TB*L rows.
# -----------------------------------------------------------------------------
def inception_kernel(x_ref, wf_ref, bf_ref, w2s_ref, b2b_ref,
                     w3s_ref, b3b_ref, w4_ref, b4_ref, o_ref,
                     *, L, dims):
    b1, b2, b3, b4 = dims
    f32 = jnp.float32
    cdt = wf_ref.dtype                        # MXU operand dtype (f32 or bf16)

    x = x_ref[...].astype(f32)                # (M, Cin)
    M = x.shape[0]

    # Local position of each row inside its length-L segment.  A grid block
    # always holds whole batch elements, so conv taps / pool windows must not
    # cross multiples of L.
    lmod = jax.lax.broadcasted_iota(jnp.int32, (M, 1), 0) % L

    def shifted(h, d, fill):
        """shifted[r] = h[r + d]; rows whose source falls outside the row's own
        length-L segment (conv/pool padding or another batch element) become
        `fill`.  Uses pltpu.roll (XLU slot, idle in this MXU-heavy kernel)."""
        rolled = pltpu.roll(h, shift=(-d) % M, axis=0)
        valid = jnp.logical_and(lmod + d >= 0, lmod + d <= L - 1)
        return jnp.where(valid, rolled, fill)

    def taps_cdt(h32, K):
        """Lane-concat the K shifted copies of h32 into one (M, K*C) MXU
        operand, cast to the operand dtype tap-by-tap so the big temporary
        lives in `cdt`.  Column order matches the row-stacked tap weights."""
        r = K // 2
        parts = []
        for d in range(-r, r + 1):
            t = h32 if d == 0 else shifted(h32, d, 0.0)
            parts.append(t.astype(cdt))
        return jnp.concatenate(parts, axis=-1)

    # ---- branches 1/2/3: the three 1x1 convs fused into one wide MXU pass --
    hf = jnp.dot(x.astype(cdt), wf_ref[...],
                 preferred_element_type=f32) + bf_ref[...]     # (M, b1+b2+b3)
    y1 = hf[:, 0:b1]                                           # branch-1 output
    h2 = hf[:, b1:b1 + b2]                                     # branch-2 hidden (f32)
    h3 = hf[:, b1 + b2:b1 + b2 + b3]                           # branch-3 hidden (f32)

    # ---- branch 2: Conv1d(k=3, pad=1) as ONE matmul with K = 3*b2 ----------
    y2 = jnp.dot(taps_cdt(h2, 3), w2s_ref[...],
                 preferred_element_type=f32) + b2b_ref[...]

    # ---- branch 3: Conv1d(k=5, pad=2) as ONE matmul with K = 5*b3 ----------
    y3 = jnp.dot(taps_cdt(h3, 5), w3s_ref[...],
                 preferred_element_type=f32) + b3b_ref[...]

    # ---- branch 4: MaxPool1d(k=3, s=1, p=1) then 1x1 conv ------------------
    # Padding positions use x itself as the fill value (neutral under max).
    xm = jnp.maximum(jnp.maximum(x, shifted(x, -1, x)), shifted(x, 1, x))
    y4 = jnp.dot(xm.astype(cdt), w4_ref[...],
                 preferred_element_type=f32) + b4_ref[...]

    # ---- single full-width, lane-dense store (no masked sub-128 column stores)
    o_ref[...] = jnp.concatenate([y1, y2, y3, y4], axis=-1).astype(o_ref.dtype)
    # TODO(synk): for model_dims whose branch offsets are not 128-aligned, an
    # optional zero-padded-width variant could remove the remaining lane
    # realignment shuffles at the cost of extra MXU flops.


# -----------------------------------------------------------------------------
# Parameter construction (deterministic, PyTorch Conv1d-style uniform init).
# Conv weights are stored as (K, Cin, Cout); biases as (1, Cout).
# -----------------------------------------------------------------------------
def make_params(key, input_dim, model_dim, dtype=jnp.float32):
    d1 = model_dim // 4
    d2 = model_dim // 2
    d3 = model_dim // 8
    d4 = model_dim - (d1 + d2 + d3)
    ks = jax.random.split(key, 12)

    def conv_w(k, cin, cout, ksize):
        bound = 1.0 / float(cin * ksize) ** 0.5
        return jax.random.uniform(k, (ksize, cin, cout), dtype, -bound, bound)

    def conv_b(k, cin, cout, ksize):
        bound = 1.0 / float(cin * ksize) ** 0.5
        return jax.random.uniform(k, (1, cout), dtype, -bound, bound)

    return dict(
        w1=conv_w(ks[0], input_dim, d1, 1)[0],  b1=conv_b(ks[1], input_dim, d1, 1),
        w2a=conv_w(ks[2], input_dim, d2, 1)[0], b2a=conv_b(ks[3], input_dim, d2, 1),
        w2b=conv_w(ks[4], d2, d2, 3),           b2b=conv_b(ks[5], d2, d2, 3),
        w3a=conv_w(ks[6], input_dim, d3, 1)[0], b3a=conv_b(ks[7], input_dim, d3, 1),
        w3b=conv_w(ks[8], d3, d3, 5),           b3b=conv_b(ks[9], d3, d3, 5),
        w4=conv_w(ks[10], input_dim, d4, 1)[0], b4=conv_b(ks[11], input_dim, d4, 1),
    )


# -----------------------------------------------------------------------------
# Tiling helpers
# -----------------------------------------------------------------------------
def _vmem_capacity_bytes():
    """Best-effort VMEM capacity query; conservative 64 MiB fallback (v7x-like)."""
    try:
        fn = getattr(pltpu, "get_tpu_info", None)
        if fn is not None:
            cap = getattr(fn(), "vmem_capacity_bytes", None)
            if cap:
                return int(cap)
    except Exception:
        pass
    return 64 << 20


def _pick_batches_per_step(B, L, cin, model_dim, dims, op_itemsize,
                           weight_bytes, budget_bytes, max_rows, min_steps):
    """Largest divisor TB of B such that one grid step (TB*L rows) fits the
    VMEM budget.  The estimate covers double-buffered x/o blocks, 2x-buffered
    weights, and the kernel's f32 / operand-dtype temporaries.  When B >= 2
    the grid is kept at >= min_steps (preferably an even number) so both v7x
    TensorCores get work."""
    d1, d2, d3, d4 = dims

    def est(rows):
        io = 2 * rows * (cin + model_dim) * 4                 # double-buffered x/o (f32)
        w = 2 * weight_bytes                                  # weights, conservatively 2x
        t32 = rows * (cin + (d1 + d2 + d3) + 2 * model_dim) * 4   # x, hf, accumulators/out
        top = rows * (2 * cin + 3 * d2 + 5 * d3) * op_itemsize    # casts + tap-concat operands
        return io + w + t32 + top

    feasible = []
    for tb in range(1, B + 1):
        if B % tb:
            continue
        rows = tb * L
        if tb != B and rows % 8 != 0:        # keep the sublane dim a multiple of 8
            continue
        if rows > max_rows or est(rows) > budget_bytes:
            continue
        feasible.append(tb)

    if not feasible:
        # TODO(synk): add a length-tiled (halo) grid if even a single batch
        # element exceeds the VMEM budget; fall back to a valid block shape.
        return 1 if (B == 1 or (L % 8 == 0)) else B

    good = [tb for tb in feasible if B // tb >= min_steps]
    if good:
        even = [tb for tb in good if (B // tb) % 2 == 0]
        return max(even) if even else max(good)
    return max(feasible)


def _const_spec(a):
    nd = a.ndim
    # TODO(synk): mark these grid-invariant weights single-buffered
    # (pipeline_mode=pl.Buffered(1)) once that path is verified on all targets;
    # the VMEM estimator above already assumes the conservative 2x footprint.
    return pl.BlockSpec(a.shape, lambda m, _nd=nd: (0,) * _nd)


# -----------------------------------------------------------------------------
# Forward wrappers
# -----------------------------------------------------------------------------
def inception_forward_nlc(x_blc, params, model_dim, operand_dtype=jnp.float32):
    """Transpose-free path: x_blc (B, L, Cin) -> (B, L, model_dim).  Prefer this
    entry point when the surrounding model keeps channels-last activations —
    it avoids two full HBM transpose passes on a near memory-bound op."""
    B, L, cin = x_blc.shape
    d1 = model_dim // 4
    d2 = model_dim // 2
    d3 = model_dim // 8
    d4 = model_dim - (d1 + d2 + d3)

    x_flat = x_blc.reshape(B * L, cin).astype(jnp.float32)

    # Fuse the three independent 1x1 convs (branches 1/2/3) into one matmul,
    # and row-stack the k=3 / k=5 conv taps so each branch is ONE matmul.
    wf = jnp.concatenate([params['w1'], params['w2a'], params['w3a']],
                         axis=1).astype(operand_dtype)
    bf = jnp.concatenate([params['b1'], params['b2a'], params['b3a']],
                         axis=1).astype(jnp.float32)
    w2s = params['w2b'].reshape(3 * d2, d2).astype(operand_dtype)   # tap-major rows
    w3s = params['w3b'].reshape(5 * d3, d3).astype(operand_dtype)

    weights = [wf, bf,
               w2s, params['b2b'].astype(jnp.float32),
               w3s, params['b3b'].astype(jnp.float32),
               params['w4'].astype(operand_dtype), params['b4'].astype(jnp.float32)]

    weight_bytes = sum(int(w.size) * jnp.dtype(w.dtype).itemsize for w in weights)
    op_itemsize = jnp.dtype(operand_dtype).itemsize

    # Per-generation VMEM budgets.
    cap = _vmem_capacity_bytes()
    if cap >= (96 << 20):                       # v5e / v6e: 128 MiB physical VMEM
        vmem_limit, budget, max_rows = 100 << 20, 72 << 20, 8192
    else:                                       # v7x (64 MiB per TC) or unknown
        vmem_limit, budget, max_rows = 44 << 20, 30 << 20, 4096

    min_steps = 2 if B >= 2 else 1
    TB = _pick_batches_per_step(B, L, cin, model_dim, (d1, d2, d3, d4),
                                op_itemsize, weight_bytes, budget, max_rows,
                                min_steps)
    TM = TB * L
    grid = (B // TB,)

    # Advisory cost estimate so XLA schedules surrounding ops sensibly.
    Mtot = B * L
    flops = 2 * Mtot * (cin * (d1 + d2 + d3) + 3 * d2 * d2 + 5 * d3 * d3 + cin * d4)
    bytes_acc = Mtot * cin * 4 + Mtot * model_dim * 4 + weight_bytes
    try:
        ce = pl.CostEstimate(flops=int(flops), transcendentals=0,
                             bytes_accessed=int(bytes_acc))
    except Exception:
        ce = None

    kernel = functools.partial(inception_kernel, L=L, dims=(d1, d2, d3, d4))

    out_flat = pl.pallas_call(
        kernel,
        out_shape=jax.ShapeDtypeStruct((B * L, model_dim), jnp.float32),
        grid=grid,
        in_specs=[pl.BlockSpec((TM, cin), lambda m: (m, 0))]
                 + [_const_spec(w) for w in weights],
        out_specs=pl.BlockSpec((TM, model_dim), lambda m: (m, 0)),
        compiler_params=pltpu.CompilerParams(
            dimension_semantics=("parallel",),
            vmem_limit_bytes=int(vmem_limit)),
        cost_estimate=ce,
    )(x_flat, *weights)

    return out_flat.reshape(B, L, model_dim)


def inception_forward(x_ncl, params, model_dim, operand_dtype=jnp.float32):
    """PyTorch-layout wrapper: x (B, Cin, L) -> (B, model_dim, L)."""
    out_blc = inception_forward_nlc(jnp.transpose(x_ncl, (0, 2, 1)), params,
                                    model_dim, operand_dtype=operand_dtype)
    return jnp.transpose(out_blc, (0, 2, 1))


# -----------------------------------------------------------------------------
# Pure-JAX reference (same math, no Pallas) for the correctness check.
# -----------------------------------------------------------------------------
def ref_forward(x_ncl, params):
    x = jnp.transpose(x_ncl, (0, 2, 1)).astype(jnp.float32)  # (B, L, Cin)
    L = x.shape[1]

    def conv1(h, w, b):
        return jnp.einsum('blc,cd->bld', h, w) + b

    def convk(h, w, b, pad):
        K = w.shape[0]
        hp = jnp.pad(h, ((0, 0), (pad, pad), (0, 0)))
        out = jnp.einsum('blc,cd->bld', hp[:, 0:L], w[0])
        for k in range(1, K):
            out = out + jnp.einsum('blc,cd->bld', hp[:, k:k + L], w[k])
        return out + b

    y1 = conv1(x, params['w1'], params['b1'])
    y2 = convk(conv1(x, params['w2a'], params['b2a']), params['w2b'], params['b2b'], 1)
    y3 = convk(conv1(x, params['w3a'], params['b3a']), params['w3b'], params['b3b'], 2)
    xp = jnp.pad(x, ((0, 0), (1, 1), (0, 0)), constant_values=-jnp.inf)
    xm = jnp.maximum(jnp.maximum(xp[:, 0:L], xp[:, 1:L + 1]), xp[:, 2:L + 2])
    y4 = conv1(xm, params['w4'], params['b4'])
    return jnp.transpose(jnp.concatenate([y1, y2, y3, y4], axis=-1), (0, 2, 1))


if __name__ == "__main__":
    B, INPUT_DIM, L, MODEL_DIM = 2, 8, 16, 32

    key = jax.random.PRNGKey(0)
    k_x, k_p = jax.random.split(key)
    x = jax.random.normal(k_x, (B, INPUT_DIM, L), dtype=jnp.float32)   # NCL like PyTorch
    params = make_params(k_p, INPUT_DIM, MODEL_DIM)

    ref = ref_forward(x, params)

    # f32 operands (exact parity with the PyTorch module)
    out = jax.block_until_ready(inception_forward(x, params, MODEL_DIM))
    assert out.shape == (B, MODEL_DIM, L), out.shape
    assert jnp.allclose(out, ref, atol=1e-4, rtol=1e-4), "mismatch vs reference (f32)"

    # bf16 MXU operands, f32 accumulation (throughput path on all generations)
    out_bf16 = jax.block_until_ready(
        inception_forward(x, params, MODEL_DIM, operand_dtype=jnp.bfloat16))
    assert jnp.allclose(out_bf16, ref, atol=1e-1, rtol=1e-1), "mismatch vs reference (bf16)"

    print("KERNEL_OK")
</pallas_src>

<mosaic_0001>
module attributes {stable_mosaic.version = 11 : i64} {
  func.func @inception_kernel(%arg0: i32, %arg1: memref<16x8xf32, #tpu.memory_space<vmem>>, %arg2: memref<8x28xf32, #tpu.memory_space<vmem>>, %arg3: memref<1x28xf32, #tpu.memory_space<vmem>>, %arg4: memref<48x16xf32, #tpu.memory_space<vmem>>, %arg5: memref<1x16xf32, #tpu.memory_space<vmem>>, %arg6: memref<20x4xf32, #tpu.memory_space<vmem>>, %arg7: memref<1x4xf32, #tpu.memory_space<vmem>>, %arg8: memref<8x4xf32, #tpu.memory_space<vmem>>, %arg9: memref<1x4xf32, #tpu.memory_space<vmem>>, %arg10: memref<16x32xf32, #tpu.memory_space<vmem>>) attributes {dimension_semantics = [#tpu.dimension_semantics<parallel>], iteration_bounds = array<i64: 2>, scalar_prefetch = 0 : i64, scratch_operands = 0 : i64, tpu.core_type = #tpu.core_type<tc>, window_params = [{transform_indices = @transform_0, window_bounds = array<i64: 16, 8>}, {pipeline_mode = #tpu.pipeline_mode<synchronous>, transform_indices = @transform_1, window_bounds = array<i64: 8, 28>}, {pipeline_mode = #tpu.pipeline_mode<synchronous>, transform_indices = @transform_2, window_bounds = array<i64: 1, 28>}, {pipeline_mode = #tpu.pipeline_mode<synchronous>, transform_indices = @transform_3, window_bounds = array<i64: 48, 16>}, {pipeline_mode = #tpu.pipeline_mode<synchronous>, transform_indices = @transform_4, window_bounds = array<i64: 1, 16>}, {pipeline_mode = #tpu.pipeline_mode<synchronous>, transform_indices = @transform_5, window_bounds = array<i64: 20, 4>}, {pipeline_mode = #tpu.pipeline_mode<synchronous>, transform_indices = @transform_6, window_bounds = array<i64: 1, 4>}, {pipeline_mode = #tpu.pipeline_mode<synchronous>, transform_indices = @transform_7, window_bounds = array<i64: 8, 4>}, {pipeline_mode = #tpu.pipeline_mode<synchronous>, transform_indices = @transform_8, window_bounds = array<i64: 1, 4>}, {transform_indices = @transform_9, window_bounds = array<i64: 16, 32>}]} {
    %c0 = arith.constant 0 : index
    %c0_0 = arith.constant 0 : index
    %0 = vector.load %arg1[%c0, %c0_0] : memref<16x8xf32, #tpu.memory_space<vmem>>, vector<16x8xf32>
    %1 = tpu.iota {dimensions = array<i32: 0>} : vector<16x1xi32>
    %c16_i32 = arith.constant 16 : i32
    %c0_i32 = arith.constant 0 : i32
    %2 = arith.cmpi eq, %c16_i32, %c0_i32 : i32
    %c1_i32 = arith.constant 1 : i32
    %3 = arith.select %2, %c1_i32, %c16_i32 : i32
    %4 = vector.broadcast %3 : i32 to vector<16x1xi32>
    %5 = arith.remsi %1, %4 : vector<16x1xi32>
    %c0_i32_1 = arith.constant 0 : i32
    %6 = vector.broadcast %c0_i32_1 : i32 to vector<16x1xi32>
    %7 = arith.cmpi ne, %5, %6 : vector<16x1xi32>
    %c0_i32_2 = arith.constant 0 : i32
    %8 = vector.broadcast %c0_i32_2 : i32 to vector<16x1xi32>
    %9 = arith.cmpi slt, %5, %8 : vector<16x1xi32>
    %c0_i32_3 = arith.constant 0 : i32
    %10 = arith.cmpi slt, %3, %c0_i32_3 : i32
    %11 = vector.broadcast %10 : i1 to vector<16x1xi1>
    %12 = vector.broadcast %11 : vector<16x1xi1> to vector<16x1xi1>
    %13 = arith.xori %9, %12 : vector<16x1xi1>
    %14 = arith.andi %13, %7 : vector<16x1xi1>
    %15 = vector.broadcast %3 : i32 to vector<16x1xi32>
    %16 = arith.addi %5, %15 : vector<16x1xi32>
    %17 = arith.select %14, %16, %5 : vector<16x1xi1>, vector<16x1xi32>
    %c0_4 = arith.constant 0 : index
    %c0_5 = arith.constant 0 : index
    %18 = vector.load %arg2[%c0_4, %c0_5] : memref<8x28xf32, #tpu.memory_space<vmem>>, vector<8x28xf32>
    %cst = arith.constant dense<0.000000e+00> : vector<16x28xf32>
    %19 = tpu.matmul %0, %18, %cst {dimension_numbers = #tpu.dot_dimension_numbers<[1], [0], [0], [1], [0, 0, 1, 1], [], []>} : vector<16x8xf32>, vector<8x28xf32>, vector<16x28xf32> -> vector<16x28xf32>
    %c0_6 = arith.constant 0 : index
    %c0_7 = arith.constant 0 : index
    %20 = vector.load %arg3[%c0_6, %c0_7] : memref<1x28xf32, #tpu.memory_space<vmem>>, vector<1x28xf32>
    %21 = vector.broadcast %20 : vector<1x28xf32> to vector<16x28xf32>
    %22 = arith.addf %19, %21 : vector<16x28xf32>
    %23 = vector.extract_strided_slice %22 {offsets = [0, 0], sizes = [16, 8], strides = [1, 1]} : vector<16x28xf32> to vector<16x8xf32>
    %24 = vector.extract_strided_slice %22 {offsets = [0, 8], sizes = [16, 16], strides = [1, 1]} : vector<16x28xf32> to vector<16x16xf32>
    %25 = vector.extract_strided_slice %22 {offsets = [0, 24], sizes = [16, 4], strides = [1, 1]} : vector<16x28xf32> to vector<16x4xf32>
    %c1_i32_8 = arith.constant 1 : i32
    %26 = tpu.dynamic_rotate %24 by %c1_i32_8 dim 0 : vector<16x16xf32>, i32 -> vector<16x16xf32>
    %c-1_i32 = arith.constant -1 : i32
    %27 = vector.broadcast %c-1_i32 : i32 to vector<16x1xi32>
    %28 = arith.addi %17, %27 : vector<16x1xi32>
    %c0_i32_9 = arith.constant 0 : i32
    %29 = vector.broadcast %c0_i32_9 : i32 to vector<16x1xi32>
    %30 = arith.cmpi sge, %28, %29 : vector<16x1xi32>
    %c-1_i32_10 = arith.constant -1 : i32
    %31 = vector.broadcast %c-1_i32_10 : i32 to vector<16x1xi32>
    %32 = arith.addi %17, %31 : vector<16x1xi32>
    %c15_i32 = arith.constant 15 : i32
    %33 = vector.broadcast %c15_i32 : i32 to vector<16x1xi32>
    %34 = arith.cmpi sle, %32, %33 : vector<16x1xi32>
    %35 = arith.andi %30, %34 : vector<16x1xi1>
    %cst_11 = arith.constant 0.000000e+00 : f32
    %36 = vector.shape_cast %35 : vector<16x1xi1> to vector<16x1xi1>
    %37 = vector.broadcast %36 : vector<16x1xi1> to vector<16x16xi1>
    %38 = vector.broadcast %cst_11 : f32 to vector<16x16xf32>
    %39 = arith.select %37, %26, %38 : vector<16x16xi1>, vector<16x16xf32>
    %c15_i32_12 = arith.constant 15 : i32
    %40 = tpu.dynamic_rotate %24 by %c15_i32_12 dim 0 : vector<16x16xf32>, i32 -> vector<16x16xf32>
    %c1_i32_13 = arith.constant 1 : i32
    %41 = vector.broadcast %c1_i32_13 : i32 to vector<16x1xi32>
    %42 = arith.addi %17, %41 : vector<16x1xi32>
    %c0_i32_14 = arith.constant 0 : i32
    %43 = vector.broadcast %c0_i32_14 : i32 to vector<16x1xi32>
    %44 = arith.cmpi sge, %42, %43 : vector<16x1xi32>
    %c1_i32_15 = arith.constant 1 : i32
    %45 = vector.broadcast %c1_i32_15 : i32 to vector<16x1xi32>
    %46 = arith.addi %17, %45 : vector<16x1xi32>
    %c15_i32_16 = arith.constant 15 : i32
    %47 = vector.broadcast %c15_i32_16 : i32 to vector<16x1xi32>
    %48 = arith.cmpi sle, %46, %47 : vector<16x1xi32>
    %49 = arith.andi %44, %48 : vector<16x1xi1>
    %cst_17 = arith.constant 0.000000e+00 : f32
    %50 = vector.shape_cast %49 : vector<16x1xi1> to vector<16x1xi1>
    %51 = vector.broadcast %50 : vector<16x1xi1> to vector<16x16xi1>
    %52 = vector.broadcast %cst_17 : f32 to vector<16x16xf32>
    %53 = arith.select %51, %40, %52 : vector<16x16xi1>, vector<16x16xf32>
    %54 = tpu.concatenate %39, %24, %53 in 1 : vector<16x16xf32>, vector<16x16xf32>, vector<16x16xf32> -> vector<16x48xf32>
    %c0_18 = arith.constant 0 : index
    %c0_19 = arith.constant 0 : index
    %55 = vector.load %arg4[%c0_18, %c0_19] : memref<48x16xf32, #tpu.memory_space<vmem>>, vector<48x16xf32>
    %cst_20 = arith.constant dense<0.000000e+00> : vector<16x16xf32>
    %56 = tpu.matmul %54, %55, %cst_20 {dimension_numbers = #tpu.dot_dimension_numbers<[1], [0], [0], [1], [0, 0, 1, 1], [], []>} : vector<16x48xf32>, vector<48x16xf32>, vector<16x16xf32> -> vector<16x16xf32>
    %c0_21 = arith.constant 0 : index
    %c0_22 = arith.constant 0 : index
    %57 = vector.load %arg5[%c0_21, %c0_22] : memref<1x16xf32, #tpu.memory_space<vmem>>, vector<1x16xf32>
    %58 = vector.broadcast %57 : vector<1x16xf32> to vector<16x16xf32>
    %59 = arith.addf %56, %58 : vector<16x16xf32>
    %c2_i32 = arith.constant 2 : i32
    %60 = tpu.dynamic_rotate %25 by %c2_i32 dim 0 : vector<16x4xf32>, i32 -> vector<16x4xf32>
    %c-2_i32 = arith.constant -2 : i32
    %61 = vector.broadcast %c-2_i32 : i32 to vector<16x1xi32>
    %62 = arith.addi %17, %61 : vector<16x1xi32>
    %c0_i32_23 = arith.constant 0 : i32
    %63 = vector.broadcast %c0_i32_23 : i32 to vector<16x1xi32>
    %64 = arith.cmpi sge, %62, %63 : vector<16x1xi32>
    %c-2_i32_24 = arith.constant -2 : i32
    %65 = vector.broadcast %c-2_i32_24 : i32 to vector<16x1xi32>
    %66 = arith.addi %17, %65 : vector<16x1xi32>
    %c15_i32_25 = arith.constant 15 : i32
    %67 = vector.broadcast %c15_i32_25 : i32 to vector<16x1xi32>
    %68 = arith.cmpi sle, %66, %67 : vector<16x1xi32>
    %69 = arith.andi %64, %68 : vector<16x1xi1>
    %cst_26 = arith.constant 0.000000e+00 : f32
    %70 = vector.shape_cast %69 : vector<16x1xi1> to vector<16x1xi1>
    %71 = vector.broadcast %70 : vector<16x1xi1> to vector<16x4xi1>
    %72 = vector.broadcast %cst_26 : f32 to vector<16x4xf32>
    %73 = arith.select %71, %60, %72 : vector<16x4xi1>, vector<16x4xf32>
    %c1_i32_27 = arith.constant 1 : i32
    %74 = tpu.dynamic_rotate %25 by %c1_i32_27 dim 0 : vector<16x4xf32>, i32 -> vector<16x4xf32>
    %c-1_i32_28 = arith.constant -1 : i32
    %75 = vector.broadcast %c-1_i32_28 : i32 to vector<16x1xi32>
    %76 = arith.addi %17, %75 : vector<16x1xi32>
    %c0_i32_29 = arith.constant 0 : i32
    %77 = vector.broadcast %c0_i32_29 : i32 to vector<16x1xi32>
    %78 = arith.cmpi sge, %76, %77 : vector<16x1xi32>
    %c-1_i32_30 = arith.constant -1 : i32
    %79 = vector.broadcast %c-1_i32_30 : i32 to vector<16x1xi32>
    %80 = arith.addi %17, %79 : vector<16x1xi32>
    %c15_i32_31 = arith.constant 15 : i32
    %81 = vector.broadcast %c15_i32_31 : i32 to vector<16x1xi32>
    %82 = arith.cmpi sle, %80, %81 : vector<16x1xi32>
    %83 = arith.andi %78, %82 : vector<16x1xi1>
    %cst_32 = arith.constant 0.000000e+00 : f32
    %84 = vector.shape_cast %83 : vector<16x1xi1> to vector<16x1xi1>
    %85 = vector.broadcast %84 : vector<16x1xi1> to vector<16x4xi1>
    %86 = vector.broadcast %cst_32 : f32 to vector<16x4xf32>
    %87 = arith.select %85, %74, %86 : vector<16x4xi1>, vector<16x4xf32>
    %c15_i32_33 = arith.constant 15 : i32
    %88 = tpu.dynamic_rotate %25 by %c15_i32_33 dim 0 : vector<16x4xf32>, i32 -> vector<16x4xf32>
    %c1_i32_34 = arith.constant 1 : i32
    %89 = vector.broadcast %c1_i32_34 : i32 to vector<16x1xi32>
    %90 = arith.addi %17, %89 : vector<16x1xi32>
    %c0_i32_35 = arith.constant 0 : i32
    %91 = vector.broadcast %c0_i32_35 : i32 to vector<16x1xi32>
    %92 = arith.cmpi sge, %90, %91 : vector<16x1xi32>
    %c1_i32_36 = arith.constant 1 : i32
    %93 = vector.broadcast %c1_i32_36 : i32 to vector<16x1xi32>
    %94 = arith.addi %17, %93 : vector<16x1xi32>
    %c15_i32_37 = arith.constant 15 : i32
    %95 = vector.broadcast %c15_i32_37 : i32 to vector<16x1xi32>
    %96 = arith.cmpi sle, %94, %95 : vector<16x1xi32>
    %97 = arith.andi %92, %96 : vector<16x1xi1>
    %cst_38 = arith.constant 0.000000e+00 : f32
    %98 = vector.shape_cast %97 : vector<16x1xi1> to vector<16x1xi1>
    %99 = vector.broadcast %98 : vector<16x1xi1> to vector<16x4xi1>
    %100 = vector.broadcast %cst_38 : f32 to vector<16x4xf32>
    %101 = arith.select %99, %88, %100 : vector<16x4xi1>, vector<16x4xf32>
    %c14_i32 = arith.constant 14 : i32
    %102 = tpu.dynamic_rotate %25 by %c14_i32 dim 0 : vector<16x4xf32>, i32 -> vector<16x4xf32>
    %c2_i32_39 = arith.constant 2 : i32
    %103 = vector.broadcast %c2_i32_39 : i32 to vector<16x1xi32>
    %104 = arith.addi %17, %103 : vector<16x1xi32>
    %c0_i32_40 = arith.constant 0 : i32
    %105 = vector.broadcast %c0_i32_40 : i32 to vector<16x1xi32>
    %106 = arith.cmpi sge, %104, %105 : vector<16x1xi32>
    %c2_i32_41 = arith.constant 2 : i32
    %107 = vector.broadcast %c2_i32_41 : i32 to vector<16x1xi32>
    %108 = arith.addi %17, %107 : vector<16x1xi32>
    %c15_i32_42 = arith.constant 15 : i32
    %109 = vector.broadcast %c15_i32_42 : i32 to vector<16x1xi32>
    %110 = arith.cmpi sle, %108, %109 : vector<16x1xi32>
    %111 = arith.andi %106, %110 : vector<16x1xi1>
    %cst_43 = arith.constant 0.000000e+00 : f32
    %112 = vector.shape_cast %111 : vector<16x1xi1> to vector<16x1xi1>
    %113 = vector.broadcast %112 : vector<16x1xi1> to vector<16x4xi1>
    %114 = vector.broadcast %cst_43 : f32 to vector<16x4xf32>
    %115 = arith.select %113, %102, %114 : vector<16x4xi1>, vector<16x4xf32>
    %116 = tpu.concatenate %73, %87, %25, %101, %115 in 1 : vector<16x4xf32>, vector<16x4xf32>, vector<16x4xf32>, vector<16x4xf32>, vector<16x4xf32> -> vector<16x20xf32>
    %c0_44 = arith.constant 0 : index
    %c0_45 = arith.constant 0 : index
    %117 = vector.load %arg6[%c0_44, %c0_45] : memref<20x4xf32, #tpu.memory_space<vmem>>, vector<20x4xf32>
    %cst_46 = arith.constant dense<0.000000e+00> : vector<16x4xf32>
    %118 = tpu.matmul %116, %117, %cst_46 {dimension_numbers = #tpu.dot_dimension_numbers<[1], [0], [0], [1], [0, 0, 1, 1], [], []>} : vector<16x20xf32>, vector<20x4xf32>, vector<16x4xf32> -> vector<16x4xf32>
    %c0_47 = arith.constant 0 : index
    %c0_48 = arith.constant 0 : index
    %119 = vector.load %arg7[%c0_47, %c0_48] : memref<1x4xf32, #tpu.memory_space<vmem>>, vector<1x4xf32>
    %120 = vector.broadcast %119 : vector<1x4xf32> to vector<16x4xf32>
    %121 = arith.addf %118, %120 : vector<16x4xf32>
    %c1_i32_49 = arith.constant 1 : i32
    %122 = tpu.dynamic_rotate %0 by %c1_i32_49 dim 0 : vector<16x8xf32>, i32 -> vector<16x8xf32>
    %c-1_i32_50 = arith.constant -1 : i32
    %123 = vector.broadcast %c-1_i32_50 : i32 to vector<16x1xi32>
    %124 = arith.addi %17, %123 : vector<16x1xi32>
    %c0_i32_51 = arith.constant 0 : i32
    %125 = vector.broadcast %c0_i32_51 : i32 to vector<16x1xi32>
    %126 = arith.cmpi sge, %124, %125 : vector<16x1xi32>
    %c-1_i32_52 = arith.constant -1 : i32
    %127 = vector.broadcast %c-1_i32_52 : i32 to vector<16x1xi32>
    %128 = arith.addi %17, %127 : vector<16x1xi32>
    %c15_i32_53 = arith.constant 15 : i32
    %129 = vector.broadcast %c15_i32_53 : i32 to vector<16x1xi32>
    %130 = arith.cmpi sle, %128, %129 : vector<16x1xi32>
    %131 = arith.andi %126, %130 : vector<16x1xi1>
    %132 = vector.shape_cast %131 : vector<16x1xi1> to vector<16x1xi1>
    %133 = vector.broadcast %132 : vector<16x1xi1> to vector<16x8xi1>
    %134 = arith.select %133, %122, %0 : vector<16x8xi1>, vector<16x8xf32>
    %135 = arith.maximumf %0, %134 : vector<16x8xf32>
    %c15_i32_54 = arith.constant 15 : i32
    %136 = tpu.dynamic_rotate %0 by %c15_i32_54 dim 0 : vector<16x8xf32>, i32 -> vector<16x8xf32>
    %c1_i32_55 = arith.constant 1 : i32
    %137 = vector.broadcast %c1_i32_55 : i32 to vector<16x1xi32>
    %138 = arith.addi %17, %137 : vector<16x1xi32>
    %c0_i32_56 = arith.constant 0 : i32
    %139 = vector.broadcast %c0_i32_56 : i32 to vector<16x1xi32>
    %140 = arith.cmpi sge, %138, %139 : vector<16x1xi32>
    %c1_i32_57 = arith.constant 1 : i32
    %141 = vector.broadcast %c1_i32_57 : i32 to vector<16x1xi32>
    %142 = arith.addi %17, %141 : vector<16x1xi32>
    %c15_i32_58 = arith.constant 15 : i32
    %143 = vector.broadcast %c15_i32_58 : i32 to vector<16x1xi32>
    %144 = arith.cmpi sle, %142, %143 : vector<16x1xi32>
    %145 = arith.andi %140, %144 : vector<16x1xi1>
    %146 = vector.shape_cast %145 : vector<16x1xi1> to vector<16x1xi1>
    %147 = vector.broadcast %146 : vector<16x1xi1> to vector<16x8xi1>
    %148 = arith.select %147, %136, %0 : vector<16x8xi1>, vector<16x8xf32>
    %149 = arith.maximumf %135, %148 : vector<16x8xf32>
    %c0_59 = arith.constant 0 : index
    %c0_60 = arith.constant 0 : index
    %150 = vector.load %arg8[%c0_59, %c0_60] : memref<8x4xf32, #tpu.memory_space<vmem>>, vector<8x4xf32>
    %cst_61 = arith.constant dense<0.000000e+00> : vector<16x4xf32>
    %151 = tpu.matmul %149, %150, %cst_61 {dimension_numbers = #tpu.dot_dimension_numbers<[1], [0], [0], [1], [0, 0, 1, 1], [], []>} : vector<16x8xf32>, vector<8x4xf32>, vector<16x4xf32> -> vector<16x4xf32>
    %c0_62 = arith.constant 0 : index
    %c0_63 = arith.constant 0 : index
    %152 = vector.load %arg9[%c0_62, %c0_63] : memref<1x4xf32, #tpu.memory_space<vmem>>, vector<1x4xf32>
    %153 = vector.broadcast %152 : vector<1x4xf32> to vector<16x4xf32>
    %154 = arith.addf %151, %153 : vector<16x4xf32>
    %155 = tpu.concatenate %23, %59, %121, %154 in 1 : vector<16x8xf32>, vector<16x16xf32>, vector<16x4xf32>, vector<16x4xf32> -> vector<16x32xf32>
    %c0_64 = arith.constant 0 : index
    %c0_65 = arith.constant 0 : index
    %156 = vector.load %arg10[%c0_64, %c0_65] : memref<16x32xf32, #tpu.memory_space<vmem>>, vector<16x32xf32>
    tpu.vector_store %arg10[%c0_64, %c0_65], %155 {strides = array<i32>} : memref<16x32xf32, #tpu.memory_space<vmem>>, vector<16x32xf32>,
    return
  }
  func.func @transform_0(%arg0: i32) -> (i32, i32) {
    %c0_i32 = arith.constant 0 : i32
    %c0_i32_0 = arith.constant 0 : i32
    return %arg0, %c0_i32 : i32, i32
  }
  func.func @transform_1(%arg0: i32) -> (i32, i32) {
    %c0_i32 = arith.constant 0 : i32
    %c0_i32_0 = arith.constant 0 : i32
    %c0_i32_1 = arith.constant 0 : i32
    return %c0_i32, %c0_i32_0 : i32, i32
  }
  func.func @transform_2(%arg0: i32) -> (i32, i32) {
    %c0_i32 = arith.constant 0 : i32
    %c0_i32_0 = arith.constant 0 : i32
    %c0_i32_1 = arith.constant 0 : i32
    return %c0_i32, %c0_i32_0 : i32, i32
  }
  func.func @transform_3(%arg0: i32) -> (i32, i32) {
    %c0_i32 = arith.constant 0 : i32
    %c0_i32_0 = arith.constant 0 : i32
    %c0_i32_1 = arith.constant 0 : i32
    return %c0_i32, %c0_i32_0 : i32, i32
  }
  func.func @transform_4(%arg0: i32) -> (i32, i32) {
    %c0_i32 = arith.constant 0 : i32
    %c0_i32_0 = arith.constant 0 : i32
    %c0_i32_1 = arith.constant 0 : i32
    return %c0_i32, %c0_i32_0 : i32, i32
  }
  func.func @transform_5(%arg0: i32) -> (i32, i32) {
    %c0_i32 = arith.constant 0 : i32
    %c0_i32_0 = arith.constant 0 : i32
    %c0_i32_1 = arith.constant 0 : i32
    return %c0_i32, %c0_i32_0 : i32, i32
  }
  func.func @transform_6(%arg0: i32) -> (i32, i32) {
    %c0_i32 = arith.constant 0 : i32
    %c0_i32_0 = arith.constant 0 : i32
    %c0_i32_1 = arith.constant 0 : i32
    return %c0_i32, %c0_i32_0 : i32, i32
  }
  func.func @transform_7(%arg0: i32) -> (i32, i32) {
    %c0_i32 = arith.constant 0 : i32
    %c0_i32_0 = arith.constant 0 : i32
    %c0_i32_1 = arith.constant 0 : i32
    return %c0_i32, %c0_i32_0 : i32, i32
  }
  func.func @transform_8(%arg0: i32) -> (i32, i32) {
    %c0_i32 = arith.constant 0 : i32
    %c0_i32_0 = arith.constant 0 : i32
    %c0_i32_1 = arith.constant 0 : i32
    return %c0_i32, %c0_i32_0 : i32, i32
  }
  func.func @transform_9(%arg0: i32) -> (i32, i32) {
    %c0_i32 = arith.constant 0 : i32
    %c0_i32_0 = arith.constant 0 : i32
    return %arg0, %c0_i32 : i32, i32
  }
}

</mosaic_0001>

<bundles_post_ra>
// kernel: tpu_custom_call.1
= control target key start
LH: loop header
LB: loop body
LE: loop exit
PB: predicated region body
PF: predicated region fallthrough
CT: control target
= control target key end

     0   :  { %14 = vsyncpa [#allocation3], 0  ;;  %s1583_s0 = inlined_call_operand.vmem [shape: f32[32,8], index: 0, kind: input, shape index: {}]   ;;  %s1584_s1 = inlined_call_operand.vmem [shape: f32[8,28], index: 1, kind: input, shape index: {}]   ;;  %s1585_s2 = inlined_call_operand.vmem [shape: f32[1,28], index: 2, kind: input, shape index: {}]   ;;  %s1586_s3 = inlined_call_operand.vmem [shape: f32[48,16], index: 3, kind: input, shape index: {}]   ;;  %s1587_s4 = inlined_call_operand.vmem [shape: f32[1,16], index: 4, kind: input, shape index: {}]   ;;  %s1588_s5 = inlined_call_operand.vmem [shape: f32[20,4], index: 5, kind: input, shape index: {}]   ;;  %s1589_s6 = inlined_call_operand.vmem [shape: f32[1,4], index: 6, kind: input, shape index: {}]   ;;  %s1590_s7 = inlined_call_operand.vmem [shape: f32[8,4], index: 7, kind: input, shape index: {}]   ;;  %s1591_s8 = inlined_call_operand.vmem [shape: f32[1,4], index: 8, kind: input, shape index: {}]   ;;  %s1592_s9 = inlined_call_operand.hbm [shape: f32[32,32], index: 9, kind: output, shape index: {}]  }
   0x1   :  { %16 = vsyncpa [#allocation3 + $0x1], 0  ;;  %s1292_s30 = smov 0   ;;  %s1294_s10 = smov 0  }
   0x2   :  { %s1296_s11 = smov 0   ;;  %s1298_s12 = smov 0  }
   0x3 LB: > { %s1313_s13 = sadd.s32 4294967295, %s1228_s12   ;;  %s1021_s14 = sadd.s32 4294967294, %s1228_s12   ;;  %s1228_s12 = sphi %s1298_s12, %s1598_s12   ;;  %s1224_s11 = sphi %s1296_s11, %s1597_s11   ;;  %s1220_s10 = sphi %s1294_s10, %s1596_s10   ;;  %s1216_s30 = sphi %s1292_s30, %s1595_s30  }
   0x4   : > { %s1317_s15 = sadd.s32 1, %s1228_s12   ;;  %s223_s16 = sadd.s32 1, %s1224_s11 }
   0x5   : > { %s220_s17 = ssub.s32 %s1228_s12, %s1317_s15  ;;  %p233_p0 = scmp.ne.s32.totalorder %s1224_s11, %s1220_s10 }
   0x6   : > { %p221_p1 = scmp.eq.s32.totalorder %s220_s17, 0  ;;  %p234_p2 = scmp.eq.s32.totalorder %s1313_s13, 1 }
   0x7   : > { %p239_p3 = scmp.ne.s32.totalorder %s1220_s10, %s1216_s30  ;;  %p240_p4 = scmp.eq.s32.totalorder %s1021_s14, 1 }
   0x8   : > { %s1328_s18 = scalar_select %p221_p1, %s1224_s11, %s223_s16  }
   0x9   : > { %p1330_p5 = por %p234_p2, %p233_p0  ;;  %p1334_p6 = por %p240_p4, %p239_p3 }
   0xa   : > { %p1024_p7 = scmp.ge.s32.totalorder %s1228_s12, 1  ;;  %p291_p8 = scmp.lt.s32.totalorder %s1228_s12, 3 }
   0xc   : > { %p292_p9 = pnand %p1024_p7, %p291_p8 }
   0xd   : > { %v363_v0 = vld [vmem:[%s1584_s1] sm:$0xff] (!%p292_p9)  ;;  %s1026_s23 = sshll.u32 (!%p292_p9), %s1313_s13, 1  ;;  %vm371_vm0 = vcmask (!%p292_p9), 64512   ;;  %s1230_s14 = smov (!%p292_p9), 120   ;;  %v336_v8 = vlaneseq (!%p292_p9)  ;;  %v520_v13 = vld [vmem:[%s1586_s3 + $0x8] sm:$0xff] (!%p292_p9)  ;;  %v521_v30 = vld [vmem:[%s1586_s3 + $0x10] sm:$0xff] (!%p292_p9) }
   0xe   : > { %295 = sbr.rel (%p292_p9) target bundleno = 850 (0x352), region = 56  ;;  %1066 = vmatprep.subr.mxu0 (!%p292_p9), %v363_v0  ;;  %p328_p10 = scmp.lt.s32.totalorder (!%p292_p9), %s1026_s23, 3  ;;  %v1028_v3 = vld [vmem:[%s1585_s2] ss:$0 sm:$0xff] (!%p292_p9)  ;;  %v711_v20 = vld [vmem:[%s1588_s5 + $0x8] sm:$0xff] (!%p292_p9)  ;;  %v522_v31 = vld [vmem:[%s1586_s3 + $0x18] sm:$0xff] (!%p292_p9) }
   0xf   : > { %1067 = vmatpush3.msra.mxu0 (!%p292_p9), %v363_v0  ;;  %s1231_s16 = smov (!%p292_p9), 104   ;;  %s1232_s17 = smov (!%p292_p9), 112   ;;  %v1372_v9 = vshrl.u32 (!%p292_p9), %v336_v8, 7  ;;  %v519_v12 = vld [vmem:[%s1586_s3] sm:$0xff] (!%p292_p9)  ;;  %v1104_v34 = vpack.c.bf16 (!%p292_p9), %v522_v31, %v521_v30  ;;  %v712_v35 = vld [vmem:[%s1588_s5 + $0x10] sm:$0xf] (!%p292_p9) }
  0x10   : > { %s1233_s21 = smov (!%p292_p9), 8   ;;  %v710_v14 = vld [vmem:[%s1588_s5] sm:$0xff] (!%p292_p9)  ;;  %v1100_v19 = vpack.c.bf16 (!%p292_p9), %v520_v13, %v519_v12  ;;  %vm727_vm5 = vcmask (!%p292_p9), 1043456   ;;  %s1234_s25 = smov (!%p292_p9), 4   ;;  %v524_v46 = vld [vmem:[%s1586_s3 + $0x28] sm:$0xff] (!%p292_p9)  ;;  %vm700_vm10 = vcmask (!%p292_p9), 31744  }
  0x11   : > { %v1375_v10 = vadd.s32 (!%p292_p9), 8, %v1372_v9  ;;  %v343_v18 = vand.u32 (!%p292_p9), 15, %v1372_v9  ;;  %v1112_v21 = vpack.c.bf16 (!%p292_p9), %v711_v20, %v710_v14  ;;  %vm482_vm1 = vcmp.lt.s32.totalorder (!%p292_p9), %v1372_v9, 7  ;;  %s1235_s26 = smov (!%p292_p9), 12   ;;  %v523_v45 = vld [vmem:[%s1586_s3 + $0x20] sm:$0xff] (!%p292_p9) }
  0x12   : > { %1101 = vmatprep.subr.bf16.mxu1 (!%p292_p9), %v1100_v19  ;;  %vm463_vm2 = vcmp.lt.s32.totalorder (!%p292_p9), %v1372_v9, 1  ;;  %vm622_vm4 = vcmp.lt.s32.totalorder (!%p292_p9), %v1372_v9, 2  ;;  %vm653_vm6 = vcmp.lt.s32.totalorder (!%p292_p9), %v1372_v9, 6  ;;  %v1108_v52 = vpack.c.bf16 (!%p292_p9), %v524_v46, %v523_v45  ;;  %v822_v58 = vld [vmem:[%s1590_s7] sm:$0xff] (!%p292_p9) }
  0x13   : > { %v350_v11 = vand.u32 (!%p292_p9), 15, %v1375_v10  ;;  %1103 = vmatpush3.bf16.msra.mxu1 (!%p292_p9), %v1100_v19  ;;  %1113 = vmatprep.subr.bf16.mxu0 (!%p292_p9), %v1112_v21  ;;  %v625_v25 = vadd.s32 (!%p292_p9), 4294967294, %v343_v18  ;;  %v1443_v44 = vadd.s32 (!%p292_p9), 4294967295, %v343_v18  ;;  %vm705_vm11 = vcmask (!%p292_p9), 97280  }
  0x14   : > { %1105 = vmatprep.subr.bf16.mxu1 (!%p292_p9), %v1104_v34  ;;  %vm513_vm12 = vcmask (!%p292_p9), 130048   ;;  %vm720_vm13 = vcmask (!%p292_p9), 162816   ;;  %vm516_vm14 = vcmask (!%p292_p9), 261120   ;;  %vm532_vm15 = vcmask (!%p292_p9), 392192  }
  0x15   : > { %s1600_s23 = smov (!%p328_p10, %s1026_s23), 3  ;;  %v1393_v17 = vadd.s32 1, %v350_v11  ;;  %vm627_vm7 = vcmp.ge.s32.totalorder %v625_v25, 0  ;;  %vm468_vm8 = vcmp.ge.s32.totalorder %v1443_v44, 0  ;;  %v657_v57 = vadd.s32 2, %v350_v11 }
  0x16   : > { %s1027_s24 = sshll.u32 %s1600_s23, 3  ;;  %s1237_s23 = smov 32   ;;  %v1031_v44 = vld [vmem:[%s1587_s4] ss:$0 sm:$0xff] }
  0x17   : > { %s331_s27 = scalar_lea.vmem %s1583_s0, %s1027_s24  ;;  %vm490_vm3 = vcmp.le.s32.totalorder %v1393_v17, 15  ;;  %1107 = vmatpush3.bf16.msra.mxu1 %v1104_v34  ;;  %vm661_vm9 = vcmp.le.s32.totalorder %v657_v57, 15 }
  0x18   : > { %v1347_v1 = vld [vmem:[%s331_s27] sm:$0xff]  ;;  %v1349_v2 = vld [vmem:[%s331_s27 + $0x8] sm:$0xff]  ;;  %1109 = vmatprep.subr.bf16.mxu1 %v1108_v52 }
  0x19   : > { %1068 = vmatprep.mubr.msk.f32.mxu0 %vm371_vm0, %v1347_v1  ;;  %v807_v8 = vrot.slane %v1349_v2, 7  ;;  %v814_v14 = vrot.slane %v1347_v1, 1 }
  0x1a   : > { %1069 = vmatmul.mubr.msk.f32.vlgmr.msra.gmra.mrb[0].mxu0 %vm371_vm0, %v1349_v2 }
  0x1b   : > { %1115 = vmatpush3.bf16.msra.mxu0 %v1112_v21  ;;  %1111 = vmatpush3.bf16.msra.mxu1 %v1108_v52 }
  0x1c   : > { %1090 = vmatprep.subr.msk.mxu0 %vm727_vm5, %v712_v35 }
  0x1f   : > { %1091 = vmatpush3.msk.msra.mxu0 %vm727_vm5, %v712_v35 }
  0x20   : > { %1095 = vmatprep.subr.mxu0 %v822_v58 }
  0xed   : > { %v1070_v4 = vpop.f32.mrb[0].mxu0 }
  0xee   : > { %v444_v5 = vpop.f32.mrb[1].mxu0  ;;  %v1362_v7 = vadd.f32 %v1070_v4, %v1028_v3 }
  0xef   : > { %v1358_v6 = vadd.f32 %v1028_v3, %v444_v5  ;;  %v806_v5 = vrot.slane %v1347_v1, 7 }
  0xf1   : > { %455 = vrot.lane.b32.xlu1 %v1358_v6, %s1230_s14  ;;  %614 = vrot.lane.b32.xlu0 %v1358_v6, %s1231_s16  ;;  %v809_v12 = vsel %vm463_vm2, %v807_v8, %v806_v5  ;;  %v808_v19 = vsel %vm463_vm2, %v806_v5, %v807_v8 }
  0xf5   : > { %457 = vrot.lane.b32.xlu1 %v1362_v7, %s1230_s14  ;;  %616 = vrot.lane.b32.xlu0 %v1362_v7, %s1231_s16  ;;  %s1236_s16 = smov 16   ;;  %s1238_s14 = smov 24  }
  0xf9   : > { %680 = vrot.lane.b32.xlu1 %v1362_v7, %s1232_s17  ;;  %678 = vrot.lane.b32.xlu0 %v1358_v6, %s1232_s17  ;;  %s324_s17 = sand.u32 1, %s1220_s10  }
  0xfa   : > { %s1025_s22 = sshll.u32 %s324_s17, 4  ;;  %s1541_s28 = scalar_lea.sflag [#allocation3], %s324_s17 }
  0xfd   : > { %501 = vrot.lane.b32.xlu1 %v1362_v7, %s1233_s21 }
 0x101   : > { %499 = vrot.lane.b32.xlu1 %v1358_v6, %s1233_s21 }
 0x163   : > { %v1387_v15 = vpop.permute.xlu1 %455  ;;  %v1389_v16 = vpop.permute.xlu0 %614 }
 0x164   : > { %v461_v22 = vrot.slane %v1387_v15, 7  ;;  %v639_v26 = vrot.slane %v1389_v16, 7  ;;  %v645_v27 = vrot.slane %v1389_v16, 1  ;;  %v620_v36 = vrot.slane %v1389_v16, 6 }
 0x165   : > { %v480_v47 = vrot.slane %v1387_v15, 1  ;;  %v651_v48 = vrot.slane %v1389_v16, 2  ;;  %v815_v15 = vrot.slane %v1349_v2, 1  ;;  %v810_v16 = vsel %vm468_vm8, %v809_v12, %v1347_v1 }
 0x166   : > { %v812_v20 = vmax.f32 %v1347_v1, %v810_v16 }
 0x167   : > { %v1402_v23 = vpop.permute.xlu1 %457  ;;  %v1404_v24 = vpop.permute.xlu0 %616  ;;  %v817_v21 = vsel %vm482_vm1, %v815_v15, %v814_v14 }
 0x168   : > { %v462_v28 = vrot.slane %v1402_v23, 7  ;;  %v640_v29 = vrot.slane %v1404_v24, 7  ;;  %v621_v32 = vrot.slane %v1404_v24, 6  ;;  %v646_v33 = vrot.slane %v1404_v24, 1 }
 0x169   : > { %v481_v40 = vrot.slane %v1402_v23, 1  ;;  %v652_v41 = vrot.slane %v1404_v24, 2  ;;  %v816_v24 = vsel %vm482_vm1, %v814_v14, %v815_v15  ;;  %v819_v1 = vsel %vm490_vm3, %v817_v21, %v1349_v2 }
 0x16a   : > { %v641_v37 = vsel %vm463_vm2, %v639_v26, %v640_v29  ;;  %v1428_v38 = vsel %vm463_vm2, %v461_v22, %v462_v28  ;;  %v1432_v39 = vsel %vm463_vm2, %v462_v28, %v461_v22  ;;  %v647_v42 = vsel %vm482_vm1, %v645_v27, %v646_v33 }
 0x16b   : > { %674 = vrot.lane.b32.xlu1 %v641_v37, %s1234_s25  ;;  %v648_v43 = vsel %vm482_vm1, %v646_v33, %v645_v27  ;;  %686 = vrot.lane.b32.xlu0 %v647_v42, %s1235_s26  ;;  %v623_v49 = vsel %vm622_vm4, %v620_v36, %v621_v32  ;;  %v624_v51 = vsel %vm622_vm4, %v621_v32, %v620_v36  ;;  %v681_v0 = vpop.permute.xlu1 %680  ;;  %v679_v4 = vpop.permute.xlu0 %678  ;;  %v478_v36 = vsel %vm468_vm8, %v1432_v39, 0.0 }
 0x16c   : > { %v650_v50 = vsel %vm490_vm3, %v648_v43, 0.0  ;;  %v654_v53 = vsel %vm653_vm6, %v651_v48, %v652_v41  ;;  %v484_v54 = vsel %vm482_vm1, %v481_v40, %v480_v47  ;;  %v637_v55 = vsel %vm627_vm7, %v624_v51, 0.0  ;;  %v1038_v51 = vld [vmem:[%s1591_s8] ss:$0 sm:$0xff] }
 0x16d   : > { %v642_v56 = vsel %vm463_vm2, %v640_v29, %v639_v26  ;;  %v498_v59 = vsel %vm490_vm3, %v484_v54, 0.0  ;;  %v655_v61 = vsel %vm653_vm6, %v652_v41, %v651_v48  ;;  %v483_v63 = vsel %vm482_vm1, %v480_v47, %v481_v40 }
 0x16e   : > { %v643_v60 = vsel %vm468_vm8, %v642_v56, 0.0  ;;  %v669_v62 = vsel %vm661_vm9, %v655_v61, 0.0  ;;  %v813_v27 = vmax.f32 %v1349_v2, %v808_v19  ;;  %v820_v31 = vmax.f32 %v812_v20, %v816_v24 }
 0x16f   : > { %688 = vrot.lane.b32.xlu1 %v650_v50, %s1235_s26  ;;  %694 = vrot.lane.b32.xlu0 %v654_v53, %s1236_s16  ;;  %v502_v3 = vpop.permute.xlu1 %501  ;;  %vm937_vm1 = vcmask 195584   ;;  %vm940_vm2 = vcmask 228352  }
 0x170   : > { %v821_v35 = vmax.f32 %v813_v27, %v819_v1  ;;  %v515_v40 = vsel %vm513_vm12, %v1428_v38, %v502_v3  ;;  %v1034_v38 = vld [vmem:[%s1589_s6] ss:$0 sm:$0xff] }
 0x173   : > { %509 = vrot.lane.b32.xlu1 %v498_v59, %s1237_s23  ;;  %672 = vrot.lane.b32.xlu0 %v643_v60, %s1234_s25  ;;  %v500_v10 = vpop.permute.xlu1 %499  ;;  %s1046_s25 = sshll.u32 %s1313_s13, 8 }
 0x174   : > { %v514_v2 = vsel %vm513_vm12, %v478_v36, %v500_v10  ;;  %s1537_s13 = scalar_lea.hbm %s1592_s9, %s1046_s25 }
 0x177   : > { %696 = vrot.lane.b32.xlu0 %v669_v62, %s1236_s16  ;;  %s1239_s16 = smov 28  }
 0x17b   : > { %507 = vrot.lane.b32.xlu0 %v483_v63, %s1237_s23  ;;  %s326_s23 = scalar_lea.vmem [#allocation2], %s1025_s22 }
 0x17c   : > { %s959_s24 = sshll.u32 %s326_s23, 4  ;;  %s1532_s24 = int_to_ptr.vmem [resolvable:$true] %s959_s24 }
 0x17d   : > { %s1166_s29 = scalar_lea.vmem %s1532_s24, 256 }
 0x17e   : > { %p1167_p11 = scmp.ne.s32.totalorder %s1532_s24, %s1166_s29 }
 0x180   : > { %p1168_p12 = pnand %p1167_p11, %p1330_p5 }
 0x182   : > { %p1169_p13 = pneg %p1168_p12 }
 0x1dd   : > { %v687_v11 = vpop.permute.xlu0 %686  ;;  %v675_v13 = vpop.permute.xlu1 %674 }
 0x1de   : > { %v702_v22 = vsel %vm700_vm10, %v623_v49, %v675_v13 }
 0x1df   : > { %v704_v29 = vsel %vm371_vm0, %v702_v22, %v681_v0 }
 0x1e1   : > { %v695_v18 = vpop.permute.xlu0 %694  ;;  %v689_v25 = vpop.permute.xlu1 %688 }
 0x1e2   : > { %v707_v32 = vsel %vm705_vm11, %v704_v29, %v689_v25 }
 0x1e5   : > { %v673_v23 = vpop.permute.xlu0 %672  ;;  %v510_v17 = vpop.permute.xlu1 %509 }
 0x1e6   : > { %v701_v26 = vsel %vm700_vm10, %v637_v55, %v673_v23  ;;  %v518_v42 = vsel %vm516_vm14, %v515_v40, %v510_v17 }
 0x1e7   : > { %v703_v28 = vsel %vm371_vm0, %v701_v26, %v679_v4 }
 0x1e8   : > { %v706_v30 = vsel %vm705_vm11, %v703_v28, %v687_v11 }
 0x1e9   : > { %v697_v9 = vpop.permute.xlu0 %696  ;;  %v708_v33 = vsel %vm513_vm12, %v706_v30, %v695_v18 }
 0x1ea   : > { %v709_v34 = vsel %vm513_vm12, %v707_v32, %v697_v9  ;;  %1092 = vmatprep.mubr.msk.f32.mxu0 %vm720_vm13, %v708_v33 }
 0x1eb   : > { %1093 = vmatmul.mubr.msk.f32.vlgmr.msra.gmra.mrb[2].mxu0 %vm720_vm13, %v709_v34 }
 0x1ec   : > { %1096 = vmatpush3.msra.mxu0 %v822_v58  ;;  %1097 = vmatprep.mubr.msk.f32.mxu0 %vm371_vm0, %v820_v31 }
 0x1ed   : > { %v508_v37 = vpop.permute.xlu0 %507 }
 0x1ee   : > { %v517_v41 = vsel %vm516_vm14, %v514_v2, %v508_v37 }
 0x1ef   : > { %1083 = vmatprep.mubr.msk.f32.mxu1 %vm532_vm15, %v517_v41  ;;  %1098 = vmatmul.mubr.msk.f32.vlgmr.msra.gmra.mrb[4].mxu0 %vm371_vm0, %v821_v35 }
 0x1f0   : > { %1084 = vmatmul.mubr.msk.f32.vlgmr.msra.gmra.mrb[0].mxu1 %vm532_vm15, %v518_v42 }
 0x2be   : > { %v1094_v39 = vpop.f32.mrb[2].mxu0 }
 0x2bf   : > { %v797_v43 = vpop.f32.mrb[3].mxu0  ;;  %v803_v52 = vadd.f32 %v1094_v39, %v1034_v38 }
 0x2c0   : > { %v798_v53 = vadd.f32 %v1034_v38, %v797_v43 }
 0x2c2   : > { %v1099_v45 = vpop.f32.mrb[4].mxu0 }
 0x2c3   : > { %v1085_v46 = vpop.f32.mrb[0].mxu1  ;;  %v902_v47 = vpop.f32.mrb[5].mxu0  ;;  %v908_v54 = vadd.f32 %v1099_v45, %v1038_v51 }
 0x2c4   : > { %v611_v48 = vadd.f32 %v1085_v46, %v1031_v44  ;;  %v605_v49 = vpop.f32.mrb[1].mxu1  ;;  %v903_v55 = vadd.f32 %v1038_v51, %v902_v47 }
 0x2c5   : > { %v606_v50 = vadd.f32 %v1031_v44, %v605_v49 }
 0x2c6   : > { %915 = vrot.lane.b32.xlu1 %v611_v48, %s1233_s21 }
 0x2c7   : > { %913 = vrot.lane.b32.xlu0 %v606_v50, %s1233_s21 }
 0x2ca   : > { %923 = vrot.lane.b32.xlu1 %v803_v52, %s1238_s14 }
 0x2cb   : > { %921 = vrot.lane.b32.xlu0 %v798_v53, %s1238_s14  ;;  %s1240_s14 = smov [#allocation2]  }
 0x2ce   : > { %931 = vrot.lane.b32.xlu1 %v908_v54, %s1239_s16 }
 0x2cf   : > { %929 = vrot.lane.b32.xlu0 %v903_v55, %s1239_s16  ;;  %s1170_s16 = sshll.u32 %s1240_s14, 4  ;;  %s1171_s16 = int_to_ptr.vmem [resolvable:$false] %s1170_s16 }
 0x2d0   : > { %s1172_s22 = scalar_lea.vmem %s1171_s16, 512  ;;  %p1173_p0 = scmp.lt.s32.totalorder %s1532_s24, %s1171_s16 }
 0x2d1   : > { %p1174_p1 = scmp.lt.s32.totalorder %s1172_s22, %s1166_s29 }
 0x2d3   : > { %p1175_p2 = por %p1174_p1, %p1173_p0 }
 0x2d5   : > { %p1176_p3 = pnand %p1175_p2, %p1169_p13 }
 0x338   : > { %v916_v56 = vpop.permute.xlu1 %915 }
 0x339   : > { %v914_v57 = vpop.permute.xlu0 %913  ;;  %v936_v60 = vsel %vm371_vm0, %v1362_v7, %v916_v56 }
 0x33a   : > { %v935_v61 = vsel %vm371_vm0, %v1358_v6, %v914_v57 }
 0x33c   : > { %v924_v58 = vpop.permute.xlu1 %923 }
 0x33d   : > { %v922_v59 = vpop.permute.xlu0 %921  ;;  %v939_v62 = vsel %vm937_vm1, %v936_v60, %v924_v58 }
 0x33e   : > { %v938_v0 = vsel %vm937_vm1, %v935_v61, %v922_v59 }
 0x340   : > { %v932_v63 = vpop.permute.xlu1 %931 }
 0x341   : > { %v942_v3 = vsel %vm940_vm2, %v939_v62, %v932_v63  ;;  %v930_v4 = vpop.permute.xlu0 %929 }
 0x342   : > { %944 = vst.msk [vmem:[%s326_s23 + $0x8] sm:$0xff] %vm516_vm14, %v942_v3  ;;  %v941_v7 = vsel %vm940_vm2, %v938_v0, %v930_v4 }
 0x343   : > { %943 = vst.msk [vmem:[%s326_s23] sm:$0xff] %vm516_vm14, %v941_v7 }
 0x344   : > { %1179 = shalt.err (!%p1176_p3)
}
 0x345   : > { %s1180_s17 = scalar_lea.hbm %s1537_s13, 256  ;;  %s1184_s26 = scalar_lea.hbm %s1592_s9, 512 }
 0x346   : > { %p1181_p4 = scmp.ne.s32.totalorder %s1537_s13, %s1180_s17  ;;  %p1185_p9 = scmp.lt.u32.totalorder %s1537_s13, %s1592_s9 }
 0x347   : > { %p1186_p10 = scmp.lt.u32.totalorder %s1184_s26, %s1180_s17  ;;  %p1188_p12 = scmp.lt.u32.totalorder %s1180_s17, %s1537_s13 }
 0x348   : > { %p1182_p7 = pnand %p1181_p4, %p1330_p5 }
 0x349   : > { %p1187_p11 = por %p1186_p10, %p1185_p9 }
 0x34a   : > { %p1183_p8 = pneg %p1182_p7 }
 0x34b   : > { %p1189_p13 = por %p1188_p12, %p1187_p11 }
 0x34d   : > { %p1190_p0 = pnand %p1189_p13, %p1183_p8 }
 0x34f   : > { %1193 = shalt.err (!%p1190_p0)
}
 0x350   : > { %s1241_s29 = smov 128  }
 0x351   : > { %1116 = dma.vmem_to_hbm [thread:$0]  (%p1330_p5), %s1532_s24, 256, %s1537_s13, %s1541_s28, %s1241_s29, %s1241_s29, %s1233_s21  }
 0x352 PF: > { %p1122_p1 = scmp.ge.s32.totalorder %s1228_s12, 2  ;;  %s974_s16 = sand.u32 1, %s1216_s30  }
 0x353   : > { %s975_s22 = scalar_lea.sflag [#allocation3], %s974_s16 }
 0x354   : > { %p1119_p2 = pnand %p1122_p1, %p1334_p6 }
 0x356   : > { %1211 = dma.done.wait (!%p1119_p2), %s975_s22, 256  }
 0x357   : > { %1213 = vsyncadd (!%p1119_p2), %s975_s22, 4294967040  ;;  %p19_p3 = scmp.ge.s32.totalorder %s1317_s15, 4   ;;  %s1595_s30 = smov %s1220_s10 }
 0x358   : > { %s1596_s10 = smov %s1224_s11  ;;  %s1597_s11 = smov %s1328_s18 }
 0x359   : > { %s1598_s12 = smov %s1317_s15  ;;  %21 = sbr.rel (!%p19_p3) target bundleno = 3 (0x3), region = 91 }
 0x360   :  { %980 = vsyncpa [#allocation3], 1 }
 0x361   :  { %982 = vsyncpa [#allocation3 + $0x1], 1 }

</bundles_post_ra>
